<compile_context>
chip_gen: v6e
topology: v6e:2x2x1
jax: 0.10.0
libtpu: 0.0.40
codegen_flags: <defaults>
</compile_context>

<pallas_src>
import functools

import jax
import jax.numpy as jnp
from jax.experimental import pallas as pl
from jax.experimental.pallas import tpu as pltpu

HIDDEN_SIZE = 32          # stand-in for AutoConfig(...).hidden_size
ENT_DIM = 100
FC_DIM = 64
CATEGORY_NUM = 8
BN_EPS = 1e-5
TB_MAX = 8192             # batch-tile rows (bf16 I/O): ~14 MiB double-buffered


def _round_up(x, m):
    return ((x + m - 1) // m) * m


def entityv2_kernel(emb_ref, ent_ref, w1a_ref, w1b_ref, bn_ref, w2_ref, w3_ref,
                    out_ref):
    # fc1 on the split inputs (== concat([embed, ent]) @ W1^T). bf16 MXU, f32 acc.
    h1 = jnp.maximum(
        jnp.dot(emb_ref[...], w1a_ref[...], preferred_element_type=jnp.float32)
        + jnp.dot(ent_ref[...], w1b_ref[...], preferred_element_type=jnp.float32),
        0.0)                                                    # [tb, 64] f32

    # BatchNorm1d (eval, running stats) folded to affine: b1 = h1 * s + t.
    # Kept in f32 on the VPU (v5e has no bf16 VALU).
    b1 = h1 * bn_ref[0:1, :] + bn_ref[1:2, :]                   # [tb, 64] f32

    # Dropout(0.4) / Dropout(0.2): identity in eval mode.

    # fc2 + ReLU, residual add of the batch-normed branch (f32).
    h2 = jnp.maximum(
        jnp.dot(h1.astype(jnp.bfloat16), w2_ref[...],
                preferred_element_type=jnp.float32), 0.0) + b1  # [tb, 64] f32

    # fc3 straight into the narrow [tb, CATEGORY_NUM] output (no lane padding).
    out_ref[...] = jnp.dot(h2.astype(jnp.bfloat16), w3_ref[...],
                           preferred_element_type=jnp.float32
                           ).astype(out_ref.dtype)              # [tb, 8]


def prepare_params(p):
    """Split W1, fold BN into scale/shift, cast weights to bf16 (storage dtype)."""
    w1a = p["w1t"][:HIDDEN_SIZE].astype(jnp.bfloat16)           # [HIDDEN, 64]
    w1b = p["w1t"][HIDDEN_SIZE:].astype(jnp.bfloat16)           # [ENT_DIM, 64]
    s = p["gamma"] * jax.lax.rsqrt(p["var"] + BN_EPS)           # [1, 64]
    t = p["beta"] - p["mean"] * s                               # [1, 64]
    bn = jnp.concatenate([s, t], axis=0).astype(jnp.float32)    # [2, 64] f32
    return dict(w1a=w1a, w1b=w1b, bn=bn,
                w2t=p["w2t"].astype(jnp.bfloat16),
                w3t=p["w3t"].astype(jnp.bfloat16))


@functools.partial(jax.jit, static_argnames=("tb_max",))
def entityv2_forward(embed, ent_emb, kp, *, tb_max=TB_MAX):
    """embed: [B, HIDDEN_SIZE], ent_emb: [B, ENT_DIM] -> [B, CATEGORY_NUM] f32."""
    embed = embed.astype(jnp.bfloat16)      # bf16 in HBM: half the read traffic
    ent_emb = ent_emb.astype(jnp.bfloat16)
    B = embed.shape[0]

    # Batch tile: multiple of 8 sublanes, capped. When B > 8, force >= 2 grid
    # steps so ("parallel",) shards the batch across both v7x TensorCores.
    tb = min(tb_max, _round_up(B, 8))
    if B > 8:
        tb = min(tb, _round_up(pl.cdiv(B, 2), 8))

    grid = (pl.cdiv(B, tb),)      # no input padding: ragged last block is masked
    const = lambda i: (0, 0)      # weights / BN: resident, never re-fetched
    batch = lambda i: (i, 0)      # activations: tiled along batch

    flops = 2 * B * ((HIDDEN_SIZE + ENT_DIM) * FC_DIM
                     + FC_DIM * FC_DIM + FC_DIM * CATEGORY_NUM)
    w_bytes = 2 * ((HIDDEN_SIZE + ENT_DIM) * FC_DIM + FC_DIM * FC_DIM
                   + FC_DIM * CATEGORY_NUM) + 4 * 2 * FC_DIM
    bytes_accessed = B * (2 * (HIDDEN_SIZE + ENT_DIM) + 4 * CATEGORY_NUM) + w_bytes

    out = pl.pallas_call(
        entityv2_kernel,
        out_shape=jax.ShapeDtypeStruct((B, CATEGORY_NUM), jnp.float32),
        grid=grid,
        in_specs=[
            pl.BlockSpec((tb, HIDDEN_SIZE), batch),
            pl.BlockSpec((tb, ENT_DIM), batch),
            pl.BlockSpec((HIDDEN_SIZE, FC_DIM), const),
            pl.BlockSpec((ENT_DIM, FC_DIM), const),
            pl.BlockSpec((2, FC_DIM), const),
            pl.BlockSpec((FC_DIM, FC_DIM), const),
            pl.BlockSpec((FC_DIM, CATEGORY_NUM), const),
        ],
        out_specs=pl.BlockSpec((tb, CATEGORY_NUM), batch),
        compiler_params=pltpu.CompilerParams(
            dimension_semantics=("parallel",),        # megacore on v7x
            vmem_limit_bytes=32 * 1024 * 1024),       # >=16 MiB v5e default; < v7x 64 MiB
        cost_estimate=pl.CostEstimate(flops=flops, transcendentals=0,
                                      bytes_accessed=bytes_accessed),
    )(embed, ent_emb, kp["w1a"], kp["w1b"], kp["bn"], kp["w2t"], kp["w3t"])

    return out


def init_params(key):
    k1, k2, k3, k4, k5, k6, k7 = jax.random.split(key, 7)
    in1 = HIDDEN_SIZE + ENT_DIM
    # Linear weights stored as [in, out] (transpose of PyTorch's [out, in]).
    w1t = jax.random.normal(k1, (in1, FC_DIM), jnp.float32) * 0.05
    w2t = jax.random.normal(k2, (FC_DIM, FC_DIM), jnp.float32) * 0.05
    w3t = jax.random.normal(k3, (FC_DIM, CATEGORY_NUM), jnp.float32) * 0.05
    gamma = 1.0 + 0.1 * jax.random.normal(k4, (1, FC_DIM), jnp.float32)
    beta = 0.1 * jax.random.normal(k5, (1, FC_DIM), jnp.float32)
    mean = 0.1 * jax.random.normal(k6, (1, FC_DIM), jnp.float32)
    var = 1.0 + jnp.abs(0.1 * jax.random.normal(k7, (1, FC_DIM), jnp.float32))
    return dict(w1t=w1t, w2t=w2t, w3t=w3t, gamma=gamma, beta=beta,
                mean=mean, var=var)


def reference_forward(embed, ent_emb, p):
    """Pure f32 reference of the PyTorch module (eval mode)."""
    x = jnp.concatenate([embed, ent_emb], axis=1)
    h1 = jnp.maximum(x @ p["w1t"], 0.0)
    b1 = (h1 - p["mean"]) / jnp.sqrt(p["var"] + BN_EPS) * p["gamma"] + p["beta"]
    h2 = jnp.maximum(h1 @ p["w2t"], 0.0) + b1
    return h2 @ p["w3t"]


if __name__ == "__main__":
    key = jax.random.PRNGKey(0)
    kp_key, ke, kn = jax.random.split(key, 3)
    # B=100 exercises: >1 grid step (both v7x TCs) and a ragged, masked last block.
    B = 100
    raw_params = init_params(kp_key)
    kparams = prepare_params(raw_params)

    embed = jax.random.normal(ke, (B, HIDDEN_SIZE), jnp.float32)   # pooler_output stand-in
    ent_emb = jax.random.normal(kn, (B, ENT_DIM), jnp.float32)

    out = entityv2_forward(embed, ent_emb, kparams)
    out = jax.block_until_ready(out)

    ref = reference_forward(embed, ent_emb, raw_params)
    assert out.shape == (B, CATEGORY_NUM)
    # bf16 storage (f32 accumulation) vs pure-f32 reference: ~1e-2 relative.
    assert jnp.allclose(out, ref, atol=5e-2, rtol=5e-2)
    print("KERNEL_OK")
</pallas_src>

<mosaic_0001>
module attributes {stable_mosaic.version = 11 : i64} {
  func.func @entityv2_kernel(%arg0: i32, %arg1: memref<56x32xbf16, #tpu.memory_space<vmem>>, %arg2: memref<56x100xbf16, #tpu.memory_space<vmem>>, %arg3: memref<32x64xbf16, #tpu.memory_space<vmem>>, %arg4: memref<100x64xbf16, #tpu.memory_space<vmem>>, %arg5: memref<2x64xf32, #tpu.memory_space<vmem>>, %arg6: memref<64x64xbf16, #tpu.memory_space<vmem>>, %arg7: memref<64x8xbf16, #tpu.memory_space<vmem>>, %arg8: memref<56x8xf32, #tpu.memory_space<vmem>>) attributes {dimension_semantics = [#tpu.dimension_semantics<parallel>], iteration_bounds = array<i64: 2>, scalar_prefetch = 0 : i64, scratch_operands = 0 : i64, tpu.core_type = #tpu.core_type<tc>, window_params = [{transform_indices = @transform_0, window_bounds = array<i64: 56, 32>}, {transform_indices = @transform_1, window_bounds = array<i64: 56, 100>}, {pipeline_mode = #tpu.pipeline_mode<synchronous>, transform_indices = @transform_2, window_bounds = array<i64: 32, 64>}, {pipeline_mode = #tpu.pipeline_mode<synchronous>, transform_indices = @transform_3, window_bounds = array<i64: 100, 64>}, {pipeline_mode = #tpu.pipeline_mode<synchronous>, transform_indices = @transform_4, window_bounds = array<i64: 2, 64>}, {pipeline_mode = #tpu.pipeline_mode<synchronous>, transform_indices = @transform_5, window_bounds = array<i64: 64, 64>}, {pipeline_mode = #tpu.pipeline_mode<synchronous>, transform_indices = @transform_6, window_bounds = array<i64: 64, 8>}, {transform_indices = @transform_7, window_bounds = array<i64: 56, 8>}]} {
    %c0 = arith.constant 0 : index
    %c0_0 = arith.constant 0 : index
    %0 = vector.load %arg1[%c0, %c0_0] : memref<56x32xbf16, #tpu.memory_space<vmem>>, vector<56x32xbf16>
    %c0_1 = arith.constant 0 : index
    %c0_2 = arith.constant 0 : index
    %1 = vector.load %arg3[%c0_1, %c0_2] : memref<32x64xbf16, #tpu.memory_space<vmem>>, vector<32x64xbf16>
    %cst = arith.constant dense<0.000000e+00> : vector<56x64xf32>
    %2 = tpu.matmul %0, %1, %cst {dimension_numbers = #tpu.dot_dimension_numbers<[1], [0], [0], [1], [0, 0, 1, 1], [], []>} : vector<56x32xbf16>, vector<32x64xbf16>, vector<56x64xf32> -> vector<56x64xf32>
    %c0_3 = arith.constant 0 : index
    %c0_4 = arith.constant 0 : index
    %3 = vector.load %arg2[%c0_3, %c0_4] : memref<56x100xbf16, #tpu.memory_space<vmem>>, vector<56x100xbf16>
    %c0_5 = arith.constant 0 : index
    %c0_6 = arith.constant 0 : index
    %4 = vector.load %arg4[%c0_5, %c0_6] : memref<100x64xbf16, #tpu.memory_space<vmem>>, vector<100x64xbf16>
    %cst_7 = arith.constant dense<0.000000e+00> : vector<56x64xf32>
    %5 = tpu.matmul %3, %4, %cst_7 {dimension_numbers = #tpu.dot_dimension_numbers<[1], [0], [0], [1], [0, 0, 1, 1], [], []>} : vector<56x100xbf16>, vector<100x64xbf16>, vector<56x64xf32> -> vector<56x64xf32>
    %6 = arith.addf %2, %5 : vector<56x64xf32>
    %cst_8 = arith.constant 0.000000e+00 : f32
    %7 = vector.broadcast %cst_8 : f32 to vector<56x64xf32>
    %8 = arith.maximumf %6, %7 : vector<56x64xf32>
    %c0_9 = arith.constant 0 : index
    %c0_10 = arith.constant 0 : index
    %9 = vector.load %arg5[%c0_9, %c0_10] : memref<2x64xf32, #tpu.memory_space<vmem>>, vector<1x64xf32>
    %10 = vector.broadcast %9 : vector<1x64xf32> to vector<56x64xf32>
    %11 = arith.mulf %8, %10 : vector<56x64xf32>
    %c1 = arith.constant 1 : index
    %c0_11 = arith.constant 0 : index
    %12 = vector.load %arg5[%c1, %c0_11] : memref<2x64xf32, #tpu.memory_space<vmem>>, vector<1x64xf32>
    %13 = vector.broadcast %12 : vector<1x64xf32> to vector<56x64xf32>
    %14 = arith.addf %11, %13 : vector<56x64xf32>
    %15 = arith.truncf %8 : vector<56x64xf32> to vector<56x64xbf16>
    %c0_12 = arith.constant 0 : index
    %c0_13 = arith.constant 0 : index
    %16 = vector.load %arg6[%c0_12, %c0_13] : memref<64x64xbf16, #tpu.memory_space<vmem>>, vector<64x64xbf16>
    %cst_14 = arith.constant dense<0.000000e+00> : vector<56x64xf32>
    %17 = tpu.matmul %15, %16, %cst_14 {dimension_numbers = #tpu.dot_dimension_numbers<[1], [0], [0], [1], [0, 0, 1, 1], [], []>} : vector<56x64xbf16>, vector<64x64xbf16>, vector<56x64xf32> -> vector<56x64xf32>
    %cst_15 = arith.constant 0.000000e+00 : f32
    %18 = vector.broadcast %cst_15 : f32 to vector<56x64xf32>
    %19 = arith.maximumf %17, %18 : vector<56x64xf32>
    %20 = arith.addf %19, %14 : vector<56x64xf32>
    %21 = arith.truncf %20 : vector<56x64xf32> to vector<56x64xbf16>
    %c0_16 = arith.constant 0 : index
    %c0_17 = arith.constant 0 : index
    %22 = vector.load %arg7[%c0_16, %c0_17] : memref<64x8xbf16, #tpu.memory_space<vmem>>, vector<64x8xbf16>
    %cst_18 = arith.constant dense<0.000000e+00> : vector<56x8xf32>
    %23 = tpu.matmul %21, %22, %cst_18 {dimension_numbers = #tpu.dot_dimension_numbers<[1], [0], [0], [1], [0, 0, 1, 1], [], []>} : vector<56x64xbf16>, vector<64x8xbf16>, vector<56x8xf32> -> vector<56x8xf32>
    %c0_19 = arith.constant 0 : index
    %c0_20 = arith.constant 0 : index
    %24 = vector.load %arg8[%c0_19, %c0_20] : memref<56x8xf32, #tpu.memory_space<vmem>>, vector<56x8xf32>
    tpu.vector_store %arg8[%c0_19, %c0_20], %23 {strides = array<i32>} : memref<56x8xf32, #tpu.memory_space<vmem>>, vector<56x8xf32>,
    return
  }
  func.func @transform_0(%arg0: i32) -> (i32, i32) {
    %c0_i32 = arith.constant 0 : i32
    %c0_i32_0 = arith.constant 0 : i32
    return %arg0, %c0_i32 : i32, i32
  }
  func.func @transform_1(%arg0: i32) -> (i32, i32) {
    %c0_i32 = arith.constant 0 : i32
    %c0_i32_0 = arith.constant 0 : i32
    return %arg0, %c0_i32 : i32, i32
  }
  func.func @transform_2(%arg0: i32) -> (i32, i32) {
    %c0_i32 = arith.constant 0 : i32
    %c0_i32_0 = arith.constant 0 : i32
    %c0_i32_1 = arith.constant 0 : i32
    return %c0_i32, %c0_i32_0 : i32, i32
  }
  func.func @transform_3(%arg0: i32) -> (i32, i32) {
    %c0_i32 = arith.constant 0 : i32
    %c0_i32_0 = arith.constant 0 : i32
    %c0_i32_1 = arith.constant 0 : i32
    return %c0_i32, %c0_i32_0 : i32, i32
  }
  func.func @transform_4(%arg0: i32) -> (i32, i32) {
    %c0_i32 = arith.constant 0 : i32
    %c0_i32_0 = arith.constant 0 : i32
    %c0_i32_1 = arith.constant 0 : i32
    return %c0_i32, %c0_i32_0 : i32, i32
  }
  func.func @transform_5(%arg0: i32) -> (i32, i32) {
    %c0_i32 = arith.constant 0 : i32
    %c0_i32_0 = arith.constant 0 : i32
    %c0_i32_1 = arith.constant 0 : i32
    return %c0_i32, %c0_i32_0 : i32, i32
  }
  func.func @transform_6(%arg0: i32) -> (i32, i32) {
    %c0_i32 = arith.constant 0 : i32
    %c0_i32_0 = arith.constant 0 : i32
    %c0_i32_1 = arith.constant 0 : i32
    return %c0_i32, %c0_i32_0 : i32, i32
  }
  func.func @transform_7(%arg0: i32) -> (i32, i32) {
    %c0_i32 = arith.constant 0 : i32
    %c0_i32_0 = arith.constant 0 : i32
    return %arg0, %c0_i32 : i32, i32
  }
}

</mosaic_0001>

<bundles_post_ra>
// kernel: entityv2_forward.1
= control target key start
LH: loop header
LB: loop body
LE: loop exit
PB: predicated region body
PF: predicated region fallthrough
CT: control target
= control target key end

     0   :  { %s1568_s24 = smov 0   ;;  %s1570_s25 = smov 0   ;;  %s1754_s0 = inlined_call_operand.vmem [shape: bf16[100,32], index: 0, kind: input, shape index: {}]   ;;  %s1755_s1 = inlined_call_operand.vmem [shape: bf16[100,100], index: 1, kind: input, shape index: {}]   ;;  %s1756_s2 = inlined_call_operand.vmem [shape: bf16[32,64], index: 2, kind: input, shape index: {}]   ;;  %s1757_s3 = inlined_call_operand.vmem [shape: bf16[100,64], index: 3, kind: input, shape index: {}]   ;;  %s1758_s4 = inlined_call_operand.vmem [shape: f32[2,64], index: 4, kind: input, shape index: {}]   ;;  %s1759_s5 = inlined_call_operand.vmem [shape: bf16[64,64], index: 5, kind: input, shape index: {}]   ;;  %s1760_s6 = inlined_call_operand.vmem [shape: bf16[64,8], index: 6, kind: input, shape index: {}]   ;;  %s1761_s7 = inlined_call_operand.vmem [shape: f32[100,8], index: 7, kind: output, shape index: {}]  }
   0x1   :  { %s1572_s26 = smov 0  }
   0x2 LB: > { %s1581_s27 = sadd.s32 4294967295, %s1494_s26   ;;  %s1583_s28 = sadd.s32 1, %s1494_s26   ;;  %s1494_s26 = sphi %s1572_s26, %s1768_s26   ;;  %s1490_s25 = sphi %s1570_s25, %s1767_s25   ;;  %s1486_s24 = sphi %s1568_s24, %s1766_s24  }
   0x3   : > { %s178_s29 = ssub.s32 %s1494_s26, %s1583_s28  ;;  %s181_s30 = sadd.s32 1, %s1490_s25 }
   0x4   : > { %p179_p0 = scmp.eq.s32.totalorder %s178_s29, 0  ;;  %p191_p1 = scmp.ne.s32.totalorder %s1490_s25, %s1486_s24 }
   0x5   : > { %p192_p2 = scmp.eq.s32.totalorder %s1581_s27, 1  ;;  %p1154_p3 = scmp.ge.s32.totalorder %s1494_s26, 1 }
   0x6   : > { %s1591_s8 = scalar_select %p179_p0, %s1490_s25, %s181_s30  }
   0x7   : > { %p1593_p4 = por %p192_p2, %p191_p1  ;;  %p265_p5 = scmp.lt.s32.totalorder %s1494_s26, 3 }
   0x9   : > { %p266_p6 = pnand %p1154_p3, %p265_p5 }
   0xa   : > { %s1604_s14 = smul.u32 (!%p266_p6), 7, %s1581_s27  ;;  %s306_s29 = sand.u32 (!%p266_p6), 1, %s1486_s24  }
   0xb   : > { %269 = sbr.rel (%p266_p6) target bundleno = 718 (0x2ce), region = 48 }
   0xc   : > { %p314_p7 = scmp.lt.s32.totalorder (!%p266_p6), %s1604_s14, 12  ;;  %s1321_s30 = smul.u32 (!%p266_p6), 56, %s306_s29 }
  0x10   : > { %v1411_v0 = vld [vmem:[%s1757_s3 + $0x30] ss:$0 sps:$4 sm:$0x33]   ;;  %vm444_vm0 = vcmask 1041408   ;;  %v1412_v1 = vld [vmem:[%s1757_s3 + $0x28] sm:$0xff]   ;;  %v1413_v3 = vld [vmem:[%s1757_s3 + $0x20] sm:$0xff]  }
  0x11   : > { %1320 = vmatprep.subr.msk.bf16.mxu0 %vm444_vm0, %v1411_v0  ;;  %v446_v2 = vsel %vm444_vm0, %v1411_v0, 0  ;;  %v1415_v4 = vld [vmem:[%s1756_s2 + $0x8] sm:$0xff]   ;;  %s315_s19 = scalar_select %p314_p7, %s1604_s14, 12  ;;  %v1417_v5 = vld [vmem:[%s1756_s2] sm:$0xff]   ;;  %v1414_v6 = vld [vmem:[%s1757_s3 + $0x18] sm:$0xff]   ;;  %vm542_vm1 = vcmask 261120  }
  0x12   : > { %1247 = vmatpush3.bf16.msra.mxu0 %v446_v2  ;;  %1268 = vmatprep.subr.bf16.mxu1 %v1415_v4  ;;  %vm431_vm2 = vcmask 818176   ;;  %v1416_v10 = vld [vmem:[%s1757_s3 + $0x10] sm:$0xff]   ;;  %v1418_v12 = vld [vmem:[%s1757_s3 + $0x8] sm:$0xff]   ;;  %v1421_v14 = vld [vmem:[%s1757_s3] sm:$0xff]   ;;  %vm686_vm3 = vcmask 523264   ;;  %vm889_vm4 = vcmask 64512  }
  0x13   : > { %1248 = vmatprep.subr.bf16.mxu0 %v1412_v1  ;;  %1269 = vmatpush3.bf16.msra.mxu1 %v1415_v4  ;;  %s1155_s22 = sshll.u32 %s315_s19, 2  ;;  %v1428_v18 = vld [vmem:[%s1759_s5 + $0x18] sm:$0xff]   ;;  %v1429_v19 = vld [vmem:[%s1759_s5 + $0x10] sm:$0xff]   ;;  %v1430_v20 = vld [vmem:[%s1759_s5 + $0x8] sm:$0xff]   ;;  %s905_s24 = ssub.s32 (%p1593_p4), 13, %s1604_s14 }
  0x14   : > { %1270 = vmatprep.subr.bf16.mxu1 %v1417_v5  ;;  %s317_s10 = scalar_lea.vmem %s1754_s0, %s1155_s22  ;;  %s331_s13 = scalar_lea.vmem %s1755_s1, %s1155_s22  ;;  %v1431_v21 = vld [vmem:[%s1759_s5] sm:$0xff]   ;;  %v1432_v22 = vld [vmem:[%s1760_s6 + $0x18] sm:$0xff]   ;;  %v1433_v57 = vld [vmem:[%s1760_s6 + $0x10] sm:$0xff]  }
  0x15   : > { %v1419_v7 = vld [vmem:[%s317_s10] sm:$0xff]   ;;  %v1420_v8 = vld [vmem:[%s317_s10 + $0x8] sm:$0xff]   ;;  %v1424_v11 = vld [vmem:[%s317_s10 + $0x10] sm:$0xff]   ;;  %s1212_s11 = smul.u32 (%p1593_p4), 56, %s1581_s27  ;;  %p906_p8 = scmp.lt.s32.totalorder (%p1593_p4), %s905_s24, 7 }
  0x16   : > { %1249 = vmatpush3.bf16.msra.mxu0 %v1412_v1  ;;  %v1422_v9 = vld [vmem:[%s331_s13] sm:$0xff]   ;;  %1272 = vmatprep.mubr.msk.bf16.mxu1 %vm542_vm1, %v1419_v7  ;;  %v1425_v13 = vld [vmem:[%s317_s10 + $0x18] ss:$0 sps:$4 sm:$0xff]   ;;  %v1423_v15 = vld [vmem:[%s331_s13 + $0x8] sm:$0xff]   ;;  %s1682_s10 = scalar_lea.vmem [#allocation2], %s1321_s30  }
  0x17   : > { %1250 = vmatprep.subr.bf16.mxu0 %v1413_v3  ;;  %1271 = vmatpush3.bf16.msra.mxu1 %v1417_v5  ;;  %v1426_v16 = vld [vmem:[%s331_s13 + $0x10] sm:$0xff]   ;;  %v1427_v17 = vld [vmem:[%s331_s13 + $0x18] ss:$0 sps:$4 sm:$0xff]   ;;  %v1434_v58 = vld [vmem:[%s1760_s6 + $0x8] sm:$0xff]   ;;  %s1705_s15 = scalar_lea.vmem (%p1593_p4), %s1761_s7, %s1212_s11  }
  0x18   : > { %1260 = vmatprep.mubr.msk.bf16.mxu0 %vm431_vm2, %v1422_v9  ;;  %1280 = vmatprep.subr.bf16.mxu1 %v1428_v18  ;;  %v1435_v59 = vld [vmem:[%s1760_s6] sm:$0xff]  }
  0x19   : > { %v1182_v60 = vld [vmem:[%s1758_s4] ss:$0 sm:$0xff]  ;;  %v1183_v1 = vld [vmem:[%s1758_s4 + $0x1] ss:$0 sm:$0xff] }
  0x1a   : > { %1251 = vmatpush3.bf16.msra.mxu0 %v1413_v3  ;;  %1273 = vmatmul.mubr.msk.bf16.vlgmr.msra.gmra.mxu1 %vm542_vm1, %v1420_v8 }
  0x1b   : > { %1252 = vmatprep.subr.bf16.mxu0 %v1414_v6  ;;  %1276 = vmatprep.mubr.msk.bf16.mxu1 %vm542_vm1, %v1424_v11 }
  0x1c   : > { %1281 = vmatpush3.bf16.msra.mxu1 %v1428_v18 }
  0x1d   : > { %1282 = vmatprep.subr.bf16.mxu1 %v1429_v19 }
  0x1e   : > { %1253 = vmatpush3.bf16.msra.mxu0 %v1414_v6 }
  0x1f   : > { %1254 = vmatprep.subr.bf16.mxu0 %v1416_v10 }
  0x20   : > { %1283 = vmatpush3.bf16.msra.mxu1 %v1429_v19 }
  0x21   : > { %1284 = vmatprep.subr.bf16.mxu1 %v1430_v20 }
  0x22   : > { %1255 = vmatpush3.bf16.msra.mxu0 %v1416_v10  ;;  %1277 = vmatmul.mubr.msk.bf16.gmra.mxu1 %vm542_vm1, %v1425_v13 }
  0x23   : > { %1256 = vmatprep.subr.bf16.mxu0 %v1418_v12 }
  0x24   : > { %1285 = vmatpush3.bf16.msra.mxu1 %v1430_v20 }
  0x25   : > { %1286 = vmatprep.subr.bf16.mxu1 %v1431_v21 }
  0x26   : > { %1257 = vmatpush3.bf16.msra.mxu0 %v1418_v12 }
  0x27   : > { %1258 = vmatprep.subr.bf16.mxu0 %v1421_v14 }
  0x28   : > { %1287 = vmatpush3.bf16.msra.mxu1 %v1431_v21 }
  0x29   : > { %1312 = vmatprep.subr.bf16.mxu1 %v1432_v22 }
  0x2a   : > { %1259 = vmatpush3.bf16.msra.mxu0 %v1421_v14 }
  0x2b   : > { %1296 = vmatprep.subr.bf16.mxu0 %v1432_v22 }
  0x2d   : > { %1261 = vmatmul.mubr.msk.bf16.vlgmr.msra.gmra.mxu0 %vm431_vm2, %v1423_v15 }
  0x2e   : > { %1264 = vmatprep.mubr.msk.bf16.mxu0 %vm431_vm2, %v1426_v16  ;;  %1297 = vmatpush3.bf16.msra.mxu0 %v1432_v22 }
  0x2f   : > { %1298 = vmatprep.subr.bf16.mxu0 %v1433_v57 }
  0x32   : > { %1299 = vmatpush3.bf16.msra.mxu0 %v1433_v57 }
  0x33   : > { %1300 = vmatprep.subr.bf16.mxu0 %v1434_v58 }
  0x35   : > { %1265 = vmatmul.mubr.msk.bf16.gmra.mxu0 %vm431_vm2, %v1427_v17 }
  0x36   : > { %1301 = vmatpush3.bf16.msra.mxu0 %v1434_v58 }
  0x37   : > { %1302 = vmatprep.subr.bf16.mxu0 %v1435_v59 }
  0x3a   : > { %1303 = vmatpush3.bf16.msra.mxu0 %v1435_v59 }
  0xda   : > { %v1274_v23 = vpop.f32.mrf.mxu1 }
  0xdc   : > { %v589_v24 = vpop.f32.mrf.mxu1 }
  0xde   : > { %v1275_v25 = vpop.f32.mrf.mxu1 }
  0xe0   : > { %v592_v26 = vpop.f32.mrf.mxu1 }
  0xe2   : > { %v1278_v27 = vpop.f32.mrf.mxu1 }
  0xe4   : > { %v605_v28 = vpop.f32.mrf.mxu1 }
  0xe6   : > { %v1279_v29 = vpop.f32.mrf.mxu1 }
  0xe8   : > { %v608_v49 = vpop.f32.mrf.mxu1 }
  0xed   : > { %v1262_v30 = vpop.f32.mrf.mxu0 }
  0xee   : > { %v598_v35 = vadd.f32 %v1274_v23, %v1262_v30 }
  0xef   : > { %v482_v31 = vpop.f32.mrf.mxu0 }
  0xf0   : > { %v590_v33 = vadd.f32 %v589_v24, %v482_v31  ;;  %v621_v42 = vmax.f32 %v598_v35, 0.0 }
  0xf1   : > { %v1263_v32 = vpop.f32.mrf.mxu0 }
  0xf2   : > { %v601_v34 = vadd.f32 %v1275_v25, %v1263_v32  ;;  %v619_v40 = vmax.f32 %v590_v33, 0.0  ;;  %v633_v62 = vmul.f32 %v1182_v60, %v621_v42 }
  0xf3   : > { %v485_v36 = vpop.f32.mrf.mxu0 }
  0xf4   : > { %v593_v37 = vadd.f32 %v592_v26, %v485_v36  ;;  %v622_v38 = vmax.f32 %v601_v34, 0.0  ;;  %v631_v0 = vmul.f32 %v1182_v60, %v619_v40  ;;  %v645_v6 = vadd.f32 %v1183_v1, %v633_v62 }
  0xf5   : > { %v1266_v39 = vpop.f32.mrf.mxu0 }
  0xf6   : > { %v620_v41 = vmax.f32 %v593_v37, 0.0  ;;  %v651_v45 = vpack.c.bf16 %v622_v38, %v621_v42  ;;  %v614_v46 = vadd.f32 %v1278_v27, %v1266_v39  ;;  %v634_v63 = vmul.f32 %v1182_v60, %v622_v38 }
  0xf7   : > { %v498_v43 = vpop.f32.mrf.mxu0  ;;  %v643_v10 = vadd.f32 %v1183_v1, %v631_v0 }
  0xf8   : > { %v650_v44 = vpack.c.bf16 %v620_v41, %v619_v40  ;;  %v606_v48 = vadd.f32 %v605_v28, %v498_v43  ;;  %v625_v52 = vmax.f32 %v614_v46, 0.0  ;;  %v632_v3 = vmul.f32 %v1182_v60, %v620_v41 }
  0xf9   : > { %v1267_v47 = vpop.f32.mrf.mxu0  ;;  %v646_v8 = vadd.f32 %v1183_v1, %v634_v63 }
  0xfa   : > { %1288 = vmatprep.mubr.msk.bf16.mxu1 %vm686_vm3, %v650_v44  ;;  %v623_v53 = vmax.f32 %v606_v48, 0.0  ;;  %v653_v56 = vpack.c.bf16 %v625_v52, %v625_v52  ;;  %v644_v14 = vadd.f32 %v1183_v1, %v632_v3  ;;  %v637_v20 = vmul.f32 %v1182_v60, %v625_v52 }
  0xfb   : > { %v501_v50 = vpop.f32.mrf.mxu0  ;;  %1289 = vmatmul.mubr.msk.bf16.vlgmr.msra.gmra.mxu1 %vm686_vm3, %v651_v45 }
  0xfc   : > { %v609_v51 = vadd.f32 %v608_v49, %v501_v50  ;;  %1316 = vmatpush3.bf16.msra.mxu1 %v1432_v22  ;;  %v635_v22 = vmul.f32 %v1182_v60, %v623_v53  ;;  %v649_v28 = vadd.f32 %v1183_v1, %v637_v20 }
  0xfd   : > { %1313 = vmatprep.subr.bf16.mxu1 %v1433_v57 }
  0xfe   : > { %v624_v54 = vmax.f32 %v609_v51, 0.0  ;;  %v647_v30 = vadd.f32 %v1183_v1, %v635_v22 }
 0x100   : > { %v652_v55 = vpack.c.bf16 %v624_v54, %v623_v53  ;;  %1317 = vmatpush3.bf16.msra.mxu1 %v1433_v57  ;;  %v636_v23 = vmul.f32 %v1182_v60, %v624_v54 }
 0x101   : > { %1314 = vmatprep.subr.bf16.mxu1 %v1434_v58 }
 0x102   : > { %1292 = vmatprep.mubr.msk.bf16.mxu1 %vm686_vm3, %v652_v55  ;;  %v648_v31 = vadd.f32 %v1183_v1, %v636_v23 }
 0x103   : > { %1293 = vmatmul.mubr.msk.bf16.gmra.mxu1 %vm686_vm3, %v653_v56 }
 0x104   : > { %1318 = vmatpush3.bf16.msra.mxu1 %v1434_v58 }
 0x105   : > { %1315 = vmatprep.subr.bf16.mxu1 %v1435_v59 }
 0x108   : > { %1319 = vmatpush3.bf16.msra.mxu1 %v1435_v59 }
 0x1bb   : > { %v1290_v61 = vpop.f32.mrf.mxu1 }
 0x1bc   : > { %v765_v4 = vmax.f32 %v1290_v61, 0.0 }
 0x1bd   : > { %v733_v2 = vpop.f32.mrf.mxu1 }
 0x1be   : > { %v763_v7 = vmax.f32 %v733_v2, 0.0  ;;  %v772_v12 = vadd.f32 %v765_v4, %v645_v6 }
 0x1bf   : > { %v1291_v5 = vpop.f32.mrf.mxu1 }
 0x1c0   : > { %v766_v9 = vmax.f32 %v1291_v5, 0.0  ;;  %v770_v17 = vadd.f32 %v763_v7, %v643_v10 }
 0x1c1   : > { %v736_v11 = vpop.f32.mrf.mxu1 }
 0x1c2   : > { %v773_v13 = vadd.f32 %v766_v9, %v646_v8  ;;  %v764_v15 = vmax.f32 %v736_v11, 0.0 }
 0x1c3   : > { %v1294_v16 = vpop.f32.mrf.mxu1 }
 0x1c4   : > { %v778_v18 = vpack.c.bf16 %v773_v13, %v772_v12  ;;  %v771_v19 = vadd.f32 %v764_v15, %v644_v14  ;;  %v769_v25 = vmax.f32 %v1294_v16, 0.0 }
 0x1c5   : > { %v749_v21 = vpop.f32.mrf.mxu1 }
 0x1c6   : > { %v777_v24 = vpack.c.bf16 %v771_v19, %v770_v17  ;;  %v767_v27 = vmax.f32 %v749_v21, 0.0  ;;  %v776_v33 = vadd.f32 %v769_v25, %v649_v28 }
 0x1c7   : > { %v1295_v26 = vpop.f32.mrf.mxu1 }
 0x1c8   : > { %1304 = vmatprep.mubr.msk.bf16.mxu0 %vm686_vm3, %v777_v24  ;;  %v774_v34 = vadd.f32 %v767_v27, %v647_v30  ;;  %v780_v37 = vpack.c.bf16 %v776_v33, %v776_v33 }
 0x1c9   : > { %v752_v29 = vpop.f32.mrf.mxu1  ;;  %1305 = vmatmul.mubr.msk.bf16.vlgmr.msra.gmra.mxu0 %vm686_vm3, %v778_v18 }
 0x1ca   : > { %v768_v32 = vmax.f32 %v752_v29, 0.0 }
 0x1cc   : > { %v775_v35 = vadd.f32 %v768_v32, %v648_v31 }
 0x1ce   : > { %v779_v36 = vpack.c.bf16 %v775_v35, %v774_v34 }
 0x1d0   : > { %1308 = vmatprep.mubr.msk.bf16.mxu1 %vm686_vm3, %v779_v36 }
 0x1d1   : > { %1309 = vmatmul.mubr.msk.bf16.vlgmr.msra.gmra.mxu1 %vm686_vm3, %v780_v37 }
 0x289   : > { %v1306_v38 = vpop.f32.mrf.mxu0 }
 0x28a   : > { %892 = vst.msk [vmem:[%s1682_s10 + $0x10] sm:$0xff] %vm889_vm4, %v1306_v38 }
 0x28b   : > { %v859_v39 = vpop.f32.mrf.mxu0 }
 0x28c   : > { %890 = vst.msk [vmem:[%s1682_s10] sm:$0xff] %vm889_vm4, %v859_v39 }
 0x28d   : > { %v1307_v40 = vpop.f32.mrf.mxu0 }
 0x28e   : > { %893 = vst.msk [vmem:[%s1682_s10 + $0x18] sm:$0xff] %vm889_vm4, %v1307_v40 }
 0x28f   : > { %v862_v41 = vpop.f32.mrf.mxu0 }
 0x290   : > { %891 = vst.msk [vmem:[%s1682_s10 + $0x8] sm:$0xff] %vm889_vm4, %v862_v41 }
 0x291   : > { %v1310_v42 = vpop.f32.mrf.mxu1 }
 0x292   : > { %896 = vst.msk [vmem:[%s1682_s10 + $0x30] sm:$0xff] %vm889_vm4, %v1310_v42 }
 0x293   : > { %v875_v43 = vpop.f32.mrf.mxu1 }
 0x294   : > { %894 = vst.msk [vmem:[%s1682_s10 + $0x20] sm:$0xff] %vm889_vm4, %v875_v43  ;;  %903 = sbr.rel (!%p1593_p4) target bundleno = 718 (0x2ce), region = 52 }
 0x295   : > { %v1311_v44 = vpop.f32.mrf.mxu1 }
 0x297   : > { %v878_v45 = vpop.f32.mrf.mxu1 }
 0x298   : > { %895 = vst.msk [vmem:[%s1682_s10 + $0x28] sm:$0xff] %vm889_vm4, %v878_v45 }
 0x299   : > { %s1770_s24 = smov (!%p906_p8, %s905_s24), 7 }
 0x29a   : > { %s1200_s16 = sshll.u32 %s1770_s24, 7 }
 0x29b   : > { %p1203_p9 = scmp.eq.s32.totalorder %s1200_s16, 0 }
 0x29c   : > { %1436 = sdivrem.u32 (!%p1203_p9), %s1770_s24, 7 }
 0x29d   : > { %914 = sbr.rel (%p1203_p9) target bundleno = 718 (0x2ce), region = 56 }
 0x2a5   : > { %s1711_s9 = spop.drf %1436 }
 0x2a6   : > { %p1204_p10 = scmp.le.s32.totalorder %s1711_s9, 0 }
 0x2a7   : > { %s1763_s27 = smov (!%p1204_p10), %s1705_s15  ;;  %s1764_s14 = smov (!%p1204_p10), %s1682_s10 }
 0x2a8   : > { %1101 = sbr.rel (%p1204_p10) target bundleno = 693 (0x2b5), region = 135  ;;  %s1720_s17 = smov (!%p1204_p10), 0  }
 0x2a9   : > { %s1722_s18 = smov (!%p1204_p10), 0  }
 0x2ad LB: >> { %v991_v46 = vld [vmem:[%s1502_s14] sm:$0xff]  ;;  %v993_v47 = vld [vmem:[%s1502_s14 + $0x8] sm:$0xff]  ;;  %v995_v48 = vld [vmem:[%s1502_s14 + $0x10] sm:$0xff]  ;;  %s1005_s19 = sadd.s32 1, %s1506_s17  ;;  %s985_s18 = sadd.s32 1, %s1510_s18   ;;  %s1510_s18 = sphi %s1722_s18, %s985_s18   ;;  %s1506_s17 = sphi %s1720_s17, %s1765_s17   ;;  %s1502_s14 = sphi %s1764_s14, %s1010_s14   ;;  %s1498_s27 = sphi %s1763_s27, %s1011_s27  }
 0x2ae   : >> { %992 = vst [vmem:[%s1498_s27] sm:$0xff] %v991_v46  ;;  %994 = vst [vmem:[%s1498_s27 + $0x8] sm:$0xff] %v993_v47  ;;  %v997_v49 = vld [vmem:[%s1502_s14 + $0x18] sm:$0xff]  ;;  %v999_v50 = vld [vmem:[%s1502_s14 + $0x20] sm:$0xff]  ;;  %p1006_p11 = scmp.ge.s32.totalorder %s1005_s19, %s1711_s9  ;;  %p984_p12 = scmp.ge.s32.totalorder %s985_s18, %s1711_s9 }
 0x2af   : >> { %996 = vst [vmem:[%s1498_s27 + $0x10] sm:$0xff] %v995_v48  ;;  %v1001_v51 = vld [vmem:[%s1502_s14 + $0x28] sm:$0xff]  ;;  %998 = vst [vmem:[%s1498_s27 + $0x18] sm:$0xff] %v997_v49  ;;  %v1003_v52 = vld [vmem:[%s1502_s14 + $0x30] sm:$0xff] }
 0x2b0   : >> { %1000 = vst [vmem:[%s1498_s27 + $0x20] sm:$0xff] %v999_v50  ;;  %1002 = vst [vmem:[%s1498_s27 + $0x28] sm:$0xff] %v1001_v51  ;;  %s1772_s19 = smov (%p1006_p11, %s1005_s19), 0  ;;  %987 = sbr.rel (!%p984_p12) target bundleno = 685 (0x2ad), region = 141 }
 0x2b1   : >> { %1004 = vst [vmem:[%s1498_s27 + $0x30] sm:$0xff] %v1003_v52  ;;  %s1008_s20 = smul.u32 56, %s1772_s19  ;;  %s1765_s17 = smov %s1772_s19 }
 0x2b3   : >> { %s1010_s14 = scalar_lea.vmem %s1682_s10, %s1008_s20 [#allocation2]   ;;  %s1011_s27 = scalar_lea.vmem %s1705_s15, %s1008_s20  }
 0x2b5 PF: > { %1438 = sdivrem.u32 %s1770_s24, 7 }
 0x2b6   : > { %s1205_s21 = smul.u32 56, %s1711_s9 }
 0x2b8   : > { %s1016_s22 = scalar_lea.vmem %s1682_s10, %s1205_s21 [#allocation2]   ;;  %s1018_s23 = scalar_lea.vmem %s1705_s15, %s1205_s21  }
 0x2be   : > { %s1439_s26 = spop.drf %1438 }
 0x2bf   : > { %p1207_p13 = scmp.le.s32.totalorder %s1439_s26, 0 }
 0x2c0   : > { %s1512_s29 = smov (!%p1207_p13), %s1018_s23   ;;  %s1516_s30 = smov (!%p1207_p13), %s1016_s22  }
 0x2c1   : > { %1115 = sbr.rel (%p1207_p13) target bundleno = 718 (0x2ce), region = 146  ;;  %s1520_s11 = smov (!%p1207_p13), 0  }
 0x2c2   : > { %s1524_s12 = smov (!%p1207_p13), 0  }
 0x2c6 LB: >> { %v1028_v53 = vld [vmem:[%s1518_s30] sm:$0xff]  ;;  %s1030_s13 = sadd.s32 1, %s1522_s11  ;;  %s1022_s12 = sadd.s32 1, %s1526_s12   ;;  %s1526_s12 = sphi %s1524_s12, %s1022_s12   ;;  %s1522_s11 = sphi %s1520_s11, %s1521_s11   ;;  %s1518_s30 = sphi %s1516_s30, %s1035_s30   ;;  %s1514_s29 = sphi %s1512_s29, %s1036_s29  }
 0x2c7   : >> { %1029 = vst [vmem:[%s1514_s29] sm:$0xff] %v1028_v53  ;;  %p1031_p0 = scmp.ge.s32.totalorder %s1030_s13, %s1439_s26  ;;  %p1021_p1 = scmp.ge.s32.totalorder %s1022_s12, %s1439_s26 }
 0x2c9   : >> { %s1774_s13 = smov (%p1031_p0, %s1030_s13), 0  ;;  %1024 = sbr.rel (!%p1021_p1) target bundleno = 710 (0x2c6), region = 152 }
 0x2ca   : >> { %s1208_s10 = sshll.u32 %s1774_s13, 3  ;;  %s1521_s11 = smov %s1774_s13  }
 0x2cb   : >> { %s1035_s30 = scalar_lea.vmem %s1016_s22, %s1208_s10 [#allocation2]   ;;  %s1036_s29 = scalar_lea.vmem %s1018_s23, %s1208_s10  }
 0x2ce PF: > { %p14_p2 = scmp.ge.s32.totalorder %s1583_s28, 4   ;;  %s1766_s24 = smov %s1490_s25 }
 0x2cf   : > { %s1767_s25 = smov %s1591_s8  ;;  %s1768_s26 = smov %s1583_s28 }
 0x2d0   :  { %16 = sbr.rel (!%p14_p2) target bundleno = 2 (0x2), region = 163 }

</bundles_post_ra>
